<compile_context>
chip_gen: v6e
topology: v6e:2x2x1
jax: 0.10.0
libtpu: 0.0.40
codegen_flags: <defaults>
</compile_context>

<pallas_src>
import functools

import jax
import jax.numpy as jnp
import numpy as np
from jax import lax
from jax.experimental import pallas as pl
from jax.experimental.pallas import tpu as pltpu


def _fold_rows(v, acc_rows):
    """Reduce a (tsub, 128) tile to (acc_rows, 128) by summing vreg groups."""
    tsub = v.shape[0]
    if tsub == acc_rows:
        return v
    # (tsub, 128) f32 is a stack of (8, 128) vregs, so this reshape is a free
    # re-tiling and the sum is a short chain of full-vreg VPU adds.
    return jnp.sum(v.reshape(tsub // acc_rows, acc_rows, 128), axis=0)


def _focal_kernel(x_ref, y_ref, loss_ref, cnt_ref, *, alphas, gamma,
                  ignore_index, n_cls, tsub, s128, jp, acc_rows,
                  need_row_mask):
    """One (batch, parallel-slice, spatial-tile) grid step.

    x_ref:    (1, C, tsub, 128) logits tile (native dtype), class-major.
    y_ref:    (1, tsub, 128)    int32 labels tile.
    loss_ref: (1, 1, acc_rows, 128) f32 resident loss accumulator.
    cnt_ref:  (1, 1, acc_rows, 128) f32 resident valid-count accumulator.
    """
    p = pl.program_id(1)
    j = pl.program_id(2)

    @pl.when(j == 0)
    def _():
        loss_ref[...] = jnp.zeros_like(loss_ref)
        cnt_ref[...] = jnp.zeros_like(cnt_ref)

    y = y_ref[0]                                     # (tsub, 128) int32
    valid = y != ignore_index

    in_bounds = None
    if need_row_mask:
        # The grid tail may run past S/128 rows (ragged last tile and/or the
        # phantom steps created by the parallel spatial split): mask those
        # rows and neutralize the (possibly stale) logits before any exp/log.
        row = (p * jp + j) * tsub + lax.broadcasted_iota(
            jnp.int32, (tsub, 128), 0)
        in_bounds = row < s128
        valid = jnp.logical_and(valid, in_bounds)

    # Per-class f32 planes: every op below runs on full (8,128) vregs.
    xs = []
    for k in range(n_cls):
        xk = x_ref[0, k].astype(jnp.float32)         # (tsub, 128)
        if in_bounds is not None:
            xk = jnp.where(in_bounds, xk, 0.0)
        xs.append(xk)

    # Class-axis max for a stable softmax.
    m = xs[0]
    for k in range(1, n_cls):
        m = jnp.maximum(m, xs[k])

    # Single fused pass over classes: sum(exp(z)) plus select-based "gathers"
    # of z_y, exp(z_y) and alpha[y] (no log_p / one-hot temporaries).
    # TODO(synk): for very large C this unrolled loop should become a
    # fori_loop over a classes-on-lanes layout.
    need_pt = gamma != 0.0
    sumexp = None
    z_y = None
    e_y = None
    a_y = None
    for k in range(n_cls):
        z = xs[k] - m
        e = jnp.exp(z)
        sumexp = e if sumexp is None else sumexp + e
        sel = y == k
        z_y = jnp.where(sel, z, 0.0 if z_y is None else z_y)
        if need_pt:
            e_y = jnp.where(sel, e, 0.0 if e_y is None else e_y)
        if alphas is not None:
            a_y = jnp.where(sel, jnp.float32(alphas[k]),
                            jnp.float32(0.0) if a_y is None else a_y)

    log_pt = z_y - jnp.log(sumexp)                   # log-softmax at label y
    ce = -log_pt if a_y is None else -(a_y * log_pt)

    if not need_pt:                                  # gamma == 0: weighted CE
        loss = ce
    else:
        pt = e_y / sumexp                            # == exp(log_pt), no extra exp
        one_m_pt = 1.0 - pt
        if float(gamma).is_integer():
            ft = one_m_pt                            # e.g. gamma=2 -> one extra mul
            for _ in range(int(gamma) - 1):
                ft = ft * one_m_pt
        else:
            # Fractional gamma: clamp avoids log(0) when pt == 1; such rows
            # are ignored / masked to zero below anyway.
            ft = jnp.exp(gamma * jnp.log(jnp.maximum(one_m_pt, 1e-30)))
        loss = ft * ce

    loss = jnp.where(valid, loss, 0.0)
    valid_f = valid.astype(jnp.float32)

    # Fold the (tsub, 128) partials down to the tiny resident accumulators.
    loss_ref[0, 0] += _fold_rows(loss, acc_rows)
    cnt_ref[0, 0] += _fold_rows(valid_f, acc_rows)


def _vmem_limit_bytes():
    """Generation-aware scoped-VMEM cap (falls back safely if query fails)."""
    cap = None
    try:
        info = pltpu.get_tpu_info()
        cap = int(getattr(info, "vmem_capacity_bytes", 0)) or None
    except Exception:
        cap = None
    if cap is None:
        cap = 128 * 1024 * 1024
    return int(max(min(cap // 2, 48 * 1024 * 1024), 16 * 1024 * 1024))


def _pick_tile_rows(c, s128, x_itemsize, y_itemsize, tile_budget_bytes):
    """Largest multiple-of-8 row tile whose working set fits the budget."""
    # Per 128-lane row: double-buffered logits+labels DMA plus ~ (C+9) f32
    # intermediate planes (x planes, max, sumexp, z_y, e_y, a_y, loss, ...).
    per_row = 128 * (2 * (c * x_itemsize + y_itemsize) + (c + 9) * 4)
    tsub = max((tile_budget_bytes // per_row) // 8 * 8, 8)
    return s128 if tsub >= s128 else int(tsub)


def focal_loss_b(x, y, *, alpha=None, gamma=0.0, reduction='mean',
                 ignore_index=-100, tile_rows=None):
    """JAX/Pallas equivalent of FocalLoss_b.forward ('mean' / 'sum')."""
    if reduction not in ('mean', 'sum', 'none'):
        raise ValueError('Reduction must be one of: "mean", "sum", "none".')
    if reduction == 'none':
        # TODO(synk): 'none' returns a dynamically-shaped per-(unignored)-row
        # vector; only 'mean'/'sum' have a static-shape Pallas equivalent.
        raise NotImplementedError("reduction='none' not supported")

    if x.ndim > 2:
        n, c = int(x.shape[0]), int(x.shape[1])
        s = int(np.prod(x.shape[2:]))
        x3 = x.reshape(n, c, s)            # free: NCHW is class-major per pos
        y3 = y.reshape(n, s)
    else:
        # (rows, C) classification path: the kernel wants class-major storage,
        # so this path pays one HBM transpose copy.
        # TODO(synk): add a classes-on-lanes kernel variant for large C.
        rows, c = int(x.shape[0]), int(x.shape[1])
        n, s = 1, rows
        x3 = jnp.transpose(x).reshape(1, c, rows)
        y3 = y.reshape(1, rows)

    # TODO(synk): int8/int16 labels could stay narrow to cut label DMA bytes;
    # kept as int32 here to avoid packed-dtype block-tiling constraints.
    if y3.dtype != jnp.int32:
        y3 = y3.astype(jnp.int32)

    # Class weights are a construction-time constant in the PyTorch module, so
    # bake them in as scalar constants (no per-step broadcast, no input stream).
    if alpha is None:
        alphas = None
    else:
        a = np.asarray(alpha, dtype=np.float32).reshape(-1)
        if a.shape[0] != c:
            raise ValueError("alpha must provide one weight per class")
        alphas = tuple(float(v) for v in a)

    # Pad the flattened spatial axis to a multiple of 128 so the lane-split
    # reshape below stays free.  Padded positions get ignore_index labels, so
    # they drop out of both the loss and the 'mean' count.  (This pad is an
    # HBM copy only when S % 128 != 0.)
    s128 = pl.cdiv(s, 128)
    s_pad = s128 * 128
    if s_pad != s:
        x3 = jnp.pad(x3, ((0, 0), (0, 0), (0, s_pad - s)))
        y3 = jnp.pad(y3, ((0, 0), (0, s_pad - s)),
                     constant_values=np.int32(ignore_index))
    x4 = x3.reshape(n, c, s128, 128)
    y4 = y3.reshape(n, s128, 128)

    # VMEM-aware spatial tile: tsub rows of 128 positions each.
    vmem_limit = _vmem_limit_bytes()
    if tile_rows is None:
        tsub = _pick_tile_rows(c, s128, jnp.dtype(x4.dtype).itemsize, 4,
                               vmem_limit // 2)
    else:
        tsub = min(int(tile_rows), s128)
        if tsub < s128:
            tsub = max(tsub // 8 * 8, 8)

    n_j = pl.cdiv(s128, tsub)
    # Second "parallel" grid axis over spatial halves keeps both v7x
    # TensorCores busy even when N == 1.  Only enabled when it creates at most
    # a small phantom tail (which is clamped + masked).
    n_p = 2 if (n_j >= 2 and (n_j % 2 == 0 or n_j >= 9)) else 1
    jp = pl.cdiv(n_j, n_p)
    last_block = n_j - 1
    need_row_mask = (n_p * jp * tsub) > s128
    acc_rows = 8 if tsub % 8 == 0 else tsub

    def x_map(i, p, j):
        return (i, 0, jnp.minimum(p * jp + j, last_block), 0)

    def y_map(i, p, j):
        return (i, jnp.minimum(p * jp + j, last_block), 0)

    def acc_map(i, p, j):
        return (i, p, 0, 0)

    kernel = functools.partial(
        _focal_kernel, alphas=alphas, gamma=float(gamma),
        ignore_index=int(ignore_index), n_cls=c, tsub=tsub, s128=s128,
        jp=jp, acc_rows=acc_rows, need_row_mask=need_row_mask)

    loss_acc, cnt_acc = pl.pallas_call(
        kernel,
        out_shape=(jax.ShapeDtypeStruct((n, n_p, acc_rows, 128), jnp.float32),
                   jax.ShapeDtypeStruct((n, n_p, acc_rows, 128), jnp.float32)),
        grid_spec=pltpu.PrefetchScalarGridSpec(
            num_scalar_prefetch=0,
            grid=(n, n_p, jp),
            in_specs=[
                pl.BlockSpec((1, c, tsub, 128), x_map),   # logits
                pl.BlockSpec((1, tsub, 128), y_map),      # labels
            ],
            out_specs=[
                pl.BlockSpec((1, 1, acc_rows, 128), acc_map),  # loss partials
                pl.BlockSpec((1, 1, acc_rows, 128), acc_map),  # valid counts
            ],
        ),
        compiler_params=pltpu.CompilerParams(
            dimension_semantics=("parallel", "parallel", "arbitrary"),
            vmem_limit_bytes=vmem_limit),
    )(x4, y4)

    total = jnp.sum(loss_acc)
    count = jnp.sum(cnt_acc)
    if reduction == 'sum':
        return total
    # The module applies .mean() to the per-row (already alpha-weighted)
    # losses of the unignored rows, i.e. divide by the COUNT of unignored
    # rows (not sum(alpha[y])), and explicitly returns 0.0 when every row is
    # ignored -- both matched here.
    return jnp.where(count > 0, total / jnp.maximum(count, 1.0),
                     jnp.float32(0.0))


def _reference(x, y, alpha, gamma, ignore_index, reduction):
    """Pure-JAX reference mirroring the PyTorch forward."""
    if x.ndim > 2:
        c = x.shape[1]
        perm = (0,) + tuple(range(2, x.ndim)) + (1,)
        x = jnp.transpose(x, perm).reshape(-1, c)
        y = y.reshape(-1)
    valid = (y != ignore_index)
    y_safe = jnp.where(valid, y, 0)
    log_p = jax.nn.log_softmax(x.astype(jnp.float32), axis=-1)
    log_pt = jnp.take_along_axis(log_p, y_safe[:, None], axis=-1)[:, 0]
    ce = -alpha[y_safe] * log_pt
    pt = jnp.exp(log_pt)
    loss = jnp.power(1.0 - pt, gamma) * ce
    loss = jnp.where(valid, loss, 0.0)
    if reduction == 'sum':
        return jnp.sum(loss)
    return jnp.sum(loss) / jnp.maximum(jnp.sum(valid.astype(jnp.float32)), 1.0)


if __name__ == "__main__":
    key = jax.random.PRNGKey(0)
    ks = jax.random.split(key, 9)

    ignore_index = -100
    alpha = jnp.array([0.1, 0.2, 0.3, 0.4], jnp.float32)

    # --- Test 1: 4D segmentation case, gamma=2, weighted, mean, ignores ---
    N, C, H, W = 2, 4, 16, 16
    x = jax.random.normal(ks[0], (N, C, H, W), jnp.float32)
    y = jax.random.randint(ks[1], (N, H, W), 0, C, jnp.int32)
    ignore_mask = jax.random.uniform(ks[2], (N, H, W)) < 0.125
    y = jnp.where(ignore_mask, jnp.int32(ignore_index), y)
    out = focal_loss_b(x, y, alpha=alpha, gamma=2.0, reduction='mean',
                       ignore_index=ignore_index)
    out = jax.block_until_ready(out)
    ref = _reference(x, y, alpha, 2.0, ignore_index, 'mean')
    np.testing.assert_allclose(np.asarray(out), np.asarray(ref),
                               rtol=1e-5, atol=1e-6)

    # --- Test 2: ragged spatial size (S=200 -> pad to 256), gamma=1.5, sum ---
    N2, C2, H2, W2 = 2, 4, 10, 20
    x2 = jax.random.normal(ks[3], (N2, C2, H2, W2), jnp.float32)
    y2 = jax.random.randint(ks[4], (N2, H2, W2), 0, C2, jnp.int32)
    out2 = focal_loss_b(x2, y2, alpha=None, gamma=1.5, reduction='sum',
                        ignore_index=ignore_index)
    out2 = jax.block_until_ready(out2)
    ref2 = _reference(x2, y2, jnp.ones((C2,), jnp.float32), 1.5,
                      ignore_index, 'sum')
    np.testing.assert_allclose(np.asarray(out2), np.asarray(ref2),
                               rtol=1e-4, atol=1e-4)

    # --- Test 3: plain 2D (batch, C) inputs, gamma=0 (pure weighted CE) ---
    xb = jax.random.normal(ks[5], (7, 4), jnp.float32)
    yb = jnp.array([0, 1, 2, 3, ignore_index, 1, 0], jnp.int32)
    out3 = focal_loss_b(xb, yb, alpha=alpha, gamma=0.0, reduction='mean',
                        ignore_index=ignore_index)
    out3 = jax.block_until_ready(out3)
    ref3 = _reference(xb, yb, alpha, 0.0, ignore_index, 'mean')
    np.testing.assert_allclose(np.asarray(out3), np.asarray(ref3),
                               rtol=1e-5, atol=1e-6)

    # --- Test 4: multi-tile path (forced tile_rows=16): ragged row mask +
    #     per-tile fold into the (8,128) accumulator ---
    N4, C4, H4, W4 = 1, 4, 96, 96
    x4t = jax.random.normal(ks[6], (N4, C4, H4, W4), jnp.float32)
    y4t = jax.random.randint(ks[7], (N4, H4, W4), 0, C4, jnp.int32)
    ig4 = jax.random.uniform(ks[8], (N4, H4, W4)) < 0.1
    y4t = jnp.where(ig4, jnp.int32(ignore_index), y4t)
    out4 = focal_loss_b(x4t, y4t, alpha=alpha, gamma=2.0, reduction='mean',
                        ignore_index=ignore_index, tile_rows=16)
    out4 = jax.block_until_ready(out4)
    ref4 = _reference(x4t, y4t, alpha, 2.0, ignore_index, 'mean')
    np.testing.assert_allclose(np.asarray(out4), np.asarray(ref4),
                               rtol=1e-4, atol=1e-5)

    # --- Test 5: forced tile_rows=8 -> 9 tiles -> parallel spatial split with
    #     a clamped + masked phantom tail step ---
    out5 = focal_loss_b(x4t, y4t, alpha=alpha, gamma=2.0, reduction='sum',
                        ignore_index=ignore_index, tile_rows=8)
    out5 = jax.block_until_ready(out5)
    ref5 = _reference(x4t, y4t, alpha, 2.0, ignore_index, 'sum')
    np.testing.assert_allclose(np.asarray(out5), np.asarray(ref5),
                               rtol=1e-4, atol=1e-3)

    print("KERNEL_OK")
</pallas_src>

<mosaic_0001>
module attributes {stable_mosaic.version = 11 : i64} {
  func.func @_focal_kernel(%arg0: i32, %arg1: i32, %arg2: i32, %arg3: memref<1x4x2x128xf32, #tpu.memory_space<vmem>>, %arg4: memref<1x2x128xi32, #tpu.memory_space<vmem>>, %arg5: memref<1x1x2x128xf32, #tpu.memory_space<vmem>>, %arg6: memref<1x1x2x128xf32, #tpu.memory_space<vmem>>) attributes {dimension_semantics = [#tpu.dimension_semantics<parallel>, #tpu.dimension_semantics<parallel>, #tpu.dimension_semantics<arbitrary>], iteration_bounds = array<i64: 2, 1, 1>, scalar_prefetch = 0 : i64, scratch_operands = 0 : i64, tpu.core_type = #tpu.core_type<tc>, window_params = [{transform_indices = @transform_0, window_bounds = array<i64: 1, 4, 2, 128>}, {transform_indices = @transform_1, window_bounds = array<i64: 1, 2, 128>}, {transform_indices = @transform_2, window_bounds = array<i64: 1, 1, 2, 128>}, {transform_indices = @transform_3, window_bounds = array<i64: 1, 1, 2, 128>}]} {
    %c0_i32 = arith.constant 0 : i32
    %0 = arith.cmpi eq, %arg2, %c0_i32 : i32
    %1 = arith.extui %0 : i1 to i32
    %c0_i32_0 = arith.constant 0 : i32
    %2 = arith.cmpi ne, %1, %c0_i32_0 : i32
    scf.if %2 {
      %cst_42 = arith.constant 0.000000e+00 : f32
      %82 = vector.broadcast %cst_42 : f32 to vector<1x1x2x128xf32>
      %c0_43 = arith.constant 0 : index
      %c0_44 = arith.constant 0 : index
      %c0_45 = arith.constant 0 : index
      %c0_46 = arith.constant 0 : index
      %83 = vector.load %arg5[%c0_43, %c0_44, %c0_45, %c0_46] : memref<1x1x2x128xf32, #tpu.memory_space<vmem>>, vector<1x1x2x128xf32>
      tpu.vector_store %arg5[%c0_43, %c0_44, %c0_45, %c0_46], %82 {strides = array<i32>} : memref<1x1x2x128xf32, #tpu.memory_space<vmem>>, vector<1x1x2x128xf32>,
      %cst_47 = arith.constant 0.000000e+00 : f32
      %84 = vector.broadcast %cst_47 : f32 to vector<1x1x2x128xf32>
      %c0_48 = arith.constant 0 : index
      %c0_49 = arith.constant 0 : index
      %c0_50 = arith.constant 0 : index
      %c0_51 = arith.constant 0 : index
      %85 = vector.load %arg6[%c0_48, %c0_49, %c0_50, %c0_51] : memref<1x1x2x128xf32, #tpu.memory_space<vmem>>, vector<1x1x2x128xf32>
      tpu.vector_store %arg6[%c0_48, %c0_49, %c0_50, %c0_51], %84 {strides = array<i32>} : memref<1x1x2x128xf32, #tpu.memory_space<vmem>>, vector<1x1x2x128xf32>,
    } else {
    }
    %c0 = arith.constant 0 : index
    %c0_1 = arith.constant 0 : index
    %c0_2 = arith.constant 0 : index
    %3 = vector.load %arg4[%c0, %c0_1, %c0_2] : memref<1x2x128xi32, #tpu.memory_space<vmem>>, vector<1x2x128xi32>
    %4 = vector.shape_cast %3 : vector<1x2x128xi32> to vector<2x128xi32>
    %c-100_i32 = arith.constant -100 : i32
    %5 = vector.broadcast %c-100_i32 : i32 to vector<2x128xi32>
    %6 = arith.cmpi ne, %4, %5 : vector<2x128xi32>
    %c0_3 = arith.constant 0 : index
    %c0_4 = arith.constant 0 : index
    %c0_5 = arith.constant 0 : index
    %c0_6 = arith.constant 0 : index
    %7 = vector.load %arg3[%c0_3, %c0_4, %c0_5, %c0_6] : memref<1x4x2x128xf32, #tpu.memory_space<vmem>>, vector<1x1x2x128xf32>
    %8 = vector.shape_cast %7 : vector<1x1x2x128xf32> to vector<2x128xf32>
    %c0_7 = arith.constant 0 : index
    %c1 = arith.constant 1 : index
    %c0_8 = arith.constant 0 : index
    %c0_9 = arith.constant 0 : index
    %9 = vector.load %arg3[%c0_7, %c1, %c0_8, %c0_9] : memref<1x4x2x128xf32, #tpu.memory_space<vmem>>, vector<1x1x2x128xf32>
    %10 = vector.shape_cast %9 : vector<1x1x2x128xf32> to vector<2x128xf32>
    %c0_10 = arith.constant 0 : index
    %c2 = arith.constant 2 : index
    %c0_11 = arith.constant 0 : index
    %c0_12 = arith.constant 0 : index
    %11 = vector.load %arg3[%c0_10, %c2, %c0_11, %c0_12] : memref<1x4x2x128xf32, #tpu.memory_space<vmem>>, vector<1x1x2x128xf32>
    %12 = vector.shape_cast %11 : vector<1x1x2x128xf32> to vector<2x128xf32>
    %c0_13 = arith.constant 0 : index
    %c3 = arith.constant 3 : index
    %c0_14 = arith.constant 0 : index
    %c0_15 = arith.constant 0 : index
    %13 = vector.load %arg3[%c0_13, %c3, %c0_14, %c0_15] : memref<1x4x2x128xf32, #tpu.memory_space<vmem>>, vector<1x1x2x128xf32>
    %14 = vector.shape_cast %13 : vector<1x1x2x128xf32> to vector<2x128xf32>
    %15 = arith.maximumf %8, %10 : vector<2x128xf32>
    %16 = arith.maximumf %15, %12 : vector<2x128xf32>
    %17 = arith.maximumf %16, %14 : vector<2x128xf32>
    %18 = arith.subf %8, %17 : vector<2x128xf32>
    %19 = math.exp %18 : vector<2x128xf32>
    %c0_i32_16 = arith.constant 0 : i32
    %20 = vector.broadcast %c0_i32_16 : i32 to vector<2x128xi32>
    %21 = arith.cmpi eq, %4, %20 : vector<2x128xi32>
    %cst = arith.constant 0.000000e+00 : f32
    %22 = vector.broadcast %cst : f32 to vector<2x128xf32>
    %23 = arith.select %21, %18, %22 : vector<2x128xi1>, vector<2x128xf32>
    %cst_17 = arith.constant 0.000000e+00 : f32
    %24 = vector.broadcast %cst_17 : f32 to vector<2x128xf32>
    %25 = arith.select %21, %19, %24 : vector<2x128xi1>, vector<2x128xf32>
    %cst_18 = arith.constant 1.000000e-01 : f32
    %cst_19 = arith.constant 0.000000e+00 : f32
    %26 = vector.broadcast %cst_18 : f32 to vector<2x128xf32>
    %27 = vector.broadcast %cst_19 : f32 to vector<2x128xf32>
    %28 = arith.select %21, %26, %27 : vector<2x128xi1>, vector<2x128xf32>
    %29 = arith.subf %10, %17 : vector<2x128xf32>
    %30 = math.exp %29 : vector<2x128xf32>
    %31 = arith.addf %19, %30 : vector<2x128xf32>
    %c1_i32 = arith.constant 1 : i32
    %32 = vector.broadcast %c1_i32 : i32 to vector<2x128xi32>
    %33 = arith.cmpi eq, %4, %32 : vector<2x128xi32>
    %34 = arith.select %33, %29, %23 : vector<2x128xi1>, vector<2x128xf32>
    %35 = arith.select %33, %30, %25 : vector<2x128xi1>, vector<2x128xf32>
    %cst_20 = arith.constant 2.000000e-01 : f32
    %36 = vector.broadcast %cst_20 : f32 to vector<2x128xf32>
    %37 = arith.select %33, %36, %28 : vector<2x128xi1>, vector<2x128xf32>
    %38 = arith.subf %12, %17 : vector<2x128xf32>
    %39 = math.exp %38 : vector<2x128xf32>
    %40 = arith.addf %31, %39 : vector<2x128xf32>
    %c2_i32 = arith.constant 2 : i32
    %41 = vector.broadcast %c2_i32 : i32 to vector<2x128xi32>
    %42 = arith.cmpi eq, %4, %41 : vector<2x128xi32>
    %43 = arith.select %42, %38, %34 : vector<2x128xi1>, vector<2x128xf32>
    %44 = arith.select %42, %39, %35 : vector<2x128xi1>, vector<2x128xf32>
    %cst_21 = arith.constant 3.000000e-01 : f32
    %45 = vector.broadcast %cst_21 : f32 to vector<2x128xf32>
    %46 = arith.select %42, %45, %37 : vector<2x128xi1>, vector<2x128xf32>
    %47 = arith.subf %14, %17 : vector<2x128xf32>
    %48 = math.exp %47 : vector<2x128xf32>
    %49 = arith.addf %40, %48 : vector<2x128xf32>
    %c3_i32 = arith.constant 3 : i32
    %50 = vector.broadcast %c3_i32 : i32 to vector<2x128xi32>
    %51 = arith.cmpi eq, %4, %50 : vector<2x128xi32>
    %52 = arith.select %51, %47, %43 : vector<2x128xi1>, vector<2x128xf32>
    %53 = arith.select %51, %48, %44 : vector<2x128xi1>, vector<2x128xf32>
    %cst_22 = arith.constant 4.000000e-01 : f32
    %54 = vector.broadcast %cst_22 : f32 to vector<2x128xf32>
    %55 = arith.select %51, %54, %46 : vector<2x128xi1>, vector<2x128xf32>
    %56 = math.log %49 : vector<2x128xf32>
    %57 = arith.subf %52, %56 : vector<2x128xf32>
    %58 = arith.mulf %55, %57 : vector<2x128xf32>
    %cst_23 = arith.constant 0.000000e+00 : f32
    %59 = vector.broadcast %cst_23 : f32 to vector<2x128xf32>
    %60 = arith.subf %59, %58 : vector<2x128xf32>
    %61 = arith.divf %53, %49 : vector<2x128xf32>
    %cst_24 = arith.constant 1.000000e+00 : f32
    %62 = vector.broadcast %cst_24 : f32 to vector<2x128xf32>
    %63 = arith.subf %62, %61 : vector<2x128xf32>
    %64 = arith.mulf %63, %63 : vector<2x128xf32>
    %65 = arith.mulf %64, %60 : vector<2x128xf32>
    %cst_25 = arith.constant 0.000000e+00 : f32
    %66 = vector.broadcast %cst_25 : f32 to vector<2x128xf32>
    %67 = arith.select %6, %65, %66 : vector<2x128xi1>, vector<2x128xf32>
    %68 = arith.extui %6 : vector<2x128xi1> to vector<2x128xi32>
    %69 = arith.sitofp %68 : vector<2x128xi32> to vector<2x128xf32>
    %c0_26 = arith.constant 0 : index
    %c0_27 = arith.constant 0 : index
    %c0_28 = arith.constant 0 : index
    %c0_29 = arith.constant 0 : index
    %70 = vector.load %arg5[%c0_26, %c0_27, %c0_28, %c0_29] : memref<1x1x2x128xf32, #tpu.memory_space<vmem>>, vector<1x1x2x128xf32>
    %71 = vector.shape_cast %70 : vector<1x1x2x128xf32> to vector<2x128xf32>
    %72 = arith.addf %71, %67 : vector<2x128xf32>
    %c0_30 = arith.constant 0 : index
    %c0_31 = arith.constant 0 : index
    %c0_32 = arith.constant 0 : index
    %c0_33 = arith.constant 0 : index
    %73 = vector.load %arg5[%c0_30, %c0_31, %c0_32, %c0_33] : memref<1x1x2x128xf32, #tpu.memory_space<vmem>>, vector<1x1x2x128xf32>
    %74 = vector.shape_cast %73 : vector<1x1x2x128xf32> to vector<2x128xf32>
    %75 = vector.shape_cast %72 : vector<2x128xf32> to vector<1x1x2x128xf32>
    tpu.vector_store %arg5[%c0_30, %c0_31, %c0_32, %c0_33], %75 {strides = array<i32>} : memref<1x1x2x128xf32, #tpu.memory_space<vmem>>, vector<1x1x2x128xf32>,
    %c0_34 = arith.constant 0 : index
    %c0_35 = arith.constant 0 : index
    %c0_36 = arith.constant 0 : index
    %c0_37 = arith.constant 0 : index
    %76 = vector.load %arg6[%c0_34, %c0_35, %c0_36, %c0_37] : memref<1x1x2x128xf32, #tpu.memory_space<vmem>>, vector<1x1x2x128xf32>
    %77 = vector.shape_cast %76 : vector<1x1x2x128xf32> to vector<2x128xf32>
    %78 = arith.addf %77, %69 : vector<2x128xf32>
    %c0_38 = arith.constant 0 : index
    %c0_39 = arith.constant 0 : index
    %c0_40 = arith.constant 0 : index
    %c0_41 = arith.constant 0 : index
    %79 = vector.load %arg6[%c0_38, %c0_39, %c0_40, %c0_41] : memref<1x1x2x128xf32, #tpu.memory_space<vmem>>, vector<1x1x2x128xf32>
    %80 = vector.shape_cast %79 : vector<1x1x2x128xf32> to vector<2x128xf32>
    %81 = vector.shape_cast %78 : vector<2x128xf32> to vector<1x1x2x128xf32>
    tpu.vector_store %arg6[%c0_38, %c0_39, %c0_40, %c0_41], %81 {strides = array<i32>} : memref<1x1x2x128xf32, #tpu.memory_space<vmem>>, vector<1x1x2x128xf32>,
    return
  }
  func.func @transform_0(%arg0: i32, %arg1: i32, %arg2: i32) -> (i32, i32, i32, i32) {
    %c1_i32 = arith.constant 1 : i32
    %0 = arith.muli %arg1, %c1_i32 : i32
    %1 = arith.addi %0, %arg2 : i32
    %c0_i32 = arith.constant 0 : i32
    %2 = arith.minsi %1, %c0_i32 : i32
    %c0_i32_0 = arith.constant 0 : i32
    %c0_i32_1 = arith.constant 0 : i32
    %c0_i32_2 = arith.constant 0 : i32
    return %arg0, %c0_i32_0, %2, %c0_i32_1 : i32, i32, i32, i32
  }
  func.func @transform_1(%arg0: i32, %arg1: i32, %arg2: i32) -> (i32, i32, i32) {
    %c1_i32 = arith.constant 1 : i32
    %0 = arith.muli %arg1, %c1_i32 : i32
    %1 = arith.addi %0, %arg2 : i32
    %c0_i32 = arith.constant 0 : i32
    %2 = arith.minsi %1, %c0_i32 : i32
    %c0_i32_0 = arith.constant 0 : i32
    %c0_i32_1 = arith.constant 0 : i32
    return %arg0, %2, %c0_i32_0 : i32, i32, i32
  }
  func.func @transform_2(%arg0: i32, %arg1: i32, %arg2: i32) -> (i32, i32, i32, i32) {
    %c0_i32 = arith.constant 0 : i32
    %c0_i32_0 = arith.constant 0 : i32
    %c0_i32_1 = arith.constant 0 : i32
    return %arg0, %arg1, %c0_i32, %c0_i32_0 : i32, i32, i32, i32
  }
  func.func @transform_3(%arg0: i32, %arg1: i32, %arg2: i32) -> (i32, i32, i32, i32) {
    %c0_i32 = arith.constant 0 : i32
    %c0_i32_0 = arith.constant 0 : i32
    %c0_i32_1 = arith.constant 0 : i32
    return %arg0, %arg1, %c0_i32, %c0_i32_0 : i32, i32, i32, i32
  }
}

</mosaic_0001>

<bundles_post_ra>
// kernel: tpu_custom_call.1
= control target key start
LH: loop header
LB: loop body
LE: loop exit
PB: predicated region body
PF: predicated region fallthrough
CT: control target
= control target key end

     0   :  { %s1059_s0 = inlined_call_operand.hbm [shape: f32[2,4,2,128], index: 0, kind: input, shape index: {}]   ;;  %s1060_s1 = inlined_call_operand.hbm [shape: s32[2,2,128], index: 1, kind: input, shape index: {}]   ;;  %s1061_s2 = inlined_call_operand.hbm [shape: f32[2,1,2,128], index: 2, kind: output, shape index: {0}]   ;;  %s1062_s3 = inlined_call_operand.hbm [shape: f32[2,1,2,128], index: 3, kind: output, shape index: {1}]  }
   0x1   :  { %1063 = sst [smem:[#allocation14_spill]] %s1059_s0 }
   0x2   :  { %9 = vsyncpa [#allocation3], 0 }
   0x3   :  { %11 = vsyncpa [#allocation3 + $0x1], 0 }
   0x4   :  { %12 = vsyncpa [#allocation6], 0 }
   0x5   :  { %14 = vsyncpa [#allocation6 + $0x1], 0 }
   0x6   :  { %15 = vsyncpa [#allocation4], 0 }
   0x7   :  { %17 = vsyncpa [#allocation4 + $0x1], 0 }
   0x8   :  { %18 = vsyncpa [#allocation9], 0 }
   0x9   :  { %20 = vsyncpa [#allocation9 + $0x1], 0  ;;  %s844_s12 = smov 0   ;;  %s846_s13 = smov 0  }
   0xa   :  { %s848_s14 = smov 0   ;;  %s850_s15 = smov 0  }
   0xb   :  { %s852_s16 = smov 0   ;;  %s854_s17 = smov 0  }
   0xc LB: > { %s533_s18 = sadd.s32 4294967295, %s815_s17   ;;  %s534_s19 = sadd.s32 4294967294, %s815_s17   ;;  %s815_s17 = sphi %s854_s17, %s26_s17   ;;  %s811_s16 = sphi %s852_s16, %s1076_s16   ;;  %s807_s15 = sphi %s850_s15, %s1075_s15   ;;  %s803_s14 = sphi %s848_s14, %s1074_s14   ;;  %s799_s13 = sphi %s846_s13, %s1073_s13   ;;  %s795_s12 = sphi %s844_s12, %s1072_s12  }
   0xd   : > { %s45_s20 = sadd.s32 1, %s811_s16  ;;  %s60_s21 = sadd.s32 1, %s803_s14 }
   0xe   : > { %p47_p0 = scmp.ge.s32.totalorder %s45_s20, 2  ;;  %p67_p1 = scmp.ne.s32.totalorder %s803_s14, %s799_s13 }
   0xf   : > { %p68_p2 = scmp.eq.s32.totalorder %s815_s17, 0  ;;  %p73_p3 = scmp.ne.s32.totalorder %s799_s13, %s795_s12 }
  0x10   : > { %s1078_s20 = smov (%p47_p0, %s45_s20), 0  ;;  %p74_p5 = scmp.eq.s32.totalorder %s533_s18, 0 }
  0x11   : > { %p885_p4 = por %p68_p2, %p67_p1  ;;  %s55_s23 = ssub.s32 %s811_s16, %s1078_s20 }
  0x12   : > { %p133_p6 = scmp.eq.s32.totalorder %s533_s18, 1  ;;  %p58_p7 = scmp.eq.s32.totalorder %s55_s23, 0 }
  0x13   : > { %p891_p8 = por %p74_p5, %p73_p3  ;;  %p139_p10 = scmp.eq.s32.totalorder %s534_s19, 1 }
  0x14   : > { %p895_p9 = por %p133_p6, %p67_p1  ;;  %p580_p13 = scmp.lt.s32.totalorder %s815_s17, 2 }
  0x15   : > { %s900_s26 = scalar_select %p58_p7, %s803_s14, %s60_s21  }
  0x16   : > { %p902_p11 = por %p139_p10, %p73_p3  ;;  %s909_s28 = sand.u32 1, %s803_s14  }
  0x17   : > { %s537_s29 = sshll.u32 %s909_s28, 3  ;;  %s557_s30 = sshll.u32 %s811_s16, 7 }
  0x18   : > { %s1068_s0 = sld [smem:[#allocation14_spill]]  ;;  %s191_s7 = scalar_lea.vmem [#allocation2], %s537_s29 }
  0x19   : > { %s202_s8 = sshll.u32 %s191_s7, 4  ;;  %p918_p0 = pnand %p580_p13, %p885_p4  ;;  %s203_s8 = int_to_ptr.vmem [resolvable:$true] %s202_s8 }
  0x1a   : > { %p542_p1 = scmp.ge.s32.totalorder %s815_s17, 1  ;;  %s188_s10 = scalar_lea.sflag [#allocation3], %s909_s28 }
  0x1b   : > { %p647_p2 = pneg %p918_p0  ;;  %s658_s11 = scalar_lea.vmem %s203_s8, 128 }
  0x1c   : > { %p659_p3 = scmp.ne.s32.totalorder %s203_s8, %s658_s11  ;;  %s817_s18 = smov [#allocation2]  }
  0x1d   : > { %s663_s19 = sshll.u32 %s817_s18, 4  ;;  %s664_s19 = int_to_ptr.vmem [resolvable:$false] %s663_s19 }
  0x1e   : > { %s201_s6 = scalar_lea.hbm %s1068_s0, %s557_s30  ;;  %p661_p5 = pnand %p659_p3, %p647_p2 }
  0x1f   : > { %s665_s21 = scalar_lea.vmem %s664_s19, 256  ;;  %p666_p4 = scmp.lt.s32.totalorder %s203_s8, %s664_s19 }
  0x20   : > { %p662_p6 = pneg %p661_p5  ;;  %p667_p7 = scmp.lt.s32.totalorder %s665_s21, %s658_s11 }
  0x22   : > { %p668_p10 = por %p667_p7, %p666_p4 }
  0x24   : > { %p669_p13 = pnand %p668_p10, %p662_p6 }
  0x26   : > { %672 = shalt.err (!%p669_p13)
}
  0x27   : > { %s818_s22 = smov 32   ;;  %s819_s23 = smov 2  }
  0x28   : > { %569 = dma.hbm_to_vmem [thread:$0]  (!%p918_p0), %s201_s6, 128, %s203_s8, %s188_s10, %s818_s22, %s818_s22, %s819_s23  }
  0x29   : > { %p232_p3 = scmp.lt.s32.totalorder %s815_s17, 3  ;;  %s540_s29 = sshll.u32 %s909_s28, 1 }
  0x2a   : > { %s541_s30 = sshll.u32 %s811_s16, 5  ;;  %s216_s18 = scalar_lea.vmem [#allocation5], %s540_s29 }
  0x2b   : > { %p936_p5 = pnand %p542_p1, %p232_p3  ;;  %s225_s11 = scalar_lea.hbm %s1060_s1, %s541_s30 }
  0x2c   : > { %s227_s19 = sshll.u32 %s216_s18, 4  ;;  %s213_s21 = scalar_lea.sflag [#allocation6], %s909_s28  ;;  %s228_s19 = int_to_ptr.vmem [resolvable:$true] %s227_s19 }
  0x2d   : > { %s686_s0 = scalar_lea.vmem %s228_s19, 32  ;;  %s820_s6 = smov [#allocation5]  }
  0x2e   : > { %p687_p6 = scmp.ne.s32.totalorder %s228_s19, %s686_s0  ;;  %s691_s8 = sshll.u32 %s820_s6, 4  ;;  %s692_s8 = int_to_ptr.vmem [resolvable:$false] %s691_s8 }
  0x2f   : > { %s693_s10 = scalar_lea.vmem %s692_s8, 64  ;;  %p694_p1 = scmp.lt.s32.totalorder %s228_s19, %s692_s8 }
  0x30   : > { %p689_p4 = pnand %p687_p6, %p647_p2  ;;  %p695_p10 = scmp.lt.s32.totalorder %s693_s10, %s686_s0 }
  0x32   : > { %p690_p7 = pneg %p689_p4  ;;  %p696_p13 = por %p695_p10, %p694_p1 }
  0x34   : > { %p697_p3 = pnand %p696_p13, %p690_p7 }
  0x36   : > { %700 = shalt.err (!%p697_p3)
}
  0x37   : > { %572 = dma.hbm_to_vmem [thread:$0]  (!%p918_p0), %s225_s11, 32, %s228_s19, %s213_s21  }
  0x38   : > { %236 = sbr.rel (%p936_p5) target bundleno = 153 (0x99), region = 28  ;;  %s952_s28 = sand.u32 (!%p936_p5), 1, %s799_s13  }
  0x39   : > { %s543_s22 = sshll.u32 (!%p936_p5), %s952_s28, 3  ;;  %s239_s23 = scalar_lea.sflag (!%p936_p5), [#allocation3], %s952_s28 }
  0x3a   : > { %s242_s29 = scalar_lea.vmem (!%p936_p5), [#allocation2], %s543_s22 }
  0x3d   : > { %778 = dma.done.wait (%p891_p8), %s239_s23, 128  }
  0x3e   : > { %780 = vsyncadd (%p891_p8), %s239_s23, 4294967168  ;;  %s544_s0 = sshll.u32 %s952_s28, 1  ;;  %s248_s9 = scalar_lea.sflag [#allocation6], %s952_s28 }
  0x3f   : > { %s251_s30 = scalar_lea.vmem [#allocation5], %s544_s0 }
  0x40   : > { %782 = dma.done.wait (%p891_p8), %s248_s9, 32  }
  0x41   : > { %784 = vsyncadd (%p891_p8), %s248_s9, 4294967264  ;;  %s966_s4 = scalar_lea.vmem [#allocation7], %s544_s0  ;;  %v821_v0 = vmov 0.0   ;;  %s283_s5 = scalar_lea.vmem [#allocation8], %s544_s0  ;;  %v971_v1 = vld [vmem:[%s251_s30] sm:$0x3] }
  0x42   : > { %294 = vst [vmem:[%s966_s4] sm:$0x3] %v821_v0  ;;  %295 = vst [vmem:[%s283_s5] sm:$0x3] %v821_v0  ;;  %v298_v2 = vld [vmem:[%s242_s29] sm:$0x3]  ;;  %v547_v3 = vld [vmem:[%s242_s29 + $0x2] sm:$0x3] }
  0x43   : > { %vm297_vm0 = vcmp.ne.s32.totalorder %v971_v1, 4294967196  ;;  %v548_v4 = vld [vmem:[%s242_s29 + $0x4] sm:$0x3]  ;;  %v305_v5 = vmax.f32 %v298_v2, %v547_v3  ;;  %v549_v6 = vld [vmem:[%s242_s29 + $0x6] sm:$0x3]  ;;  %s553_s24 = sshll.u32 %s807_s15, 5 }
  0x44   : > { %s392_s7 = sshll.u32 %s283_s5, 4  ;;  %v550_v8 = vsel %vm297_vm0, 1.0, %v821_v0  ;;  %s983_s19 = scalar_lea.hbm %s1062_s3, %s553_s24  ;;  %s985_s7 = int_to_ptr.vmem [resolvable:$true] %s392_s7 }
  0x45   : > { %v306_v7 = vmax.f32 %v305_v5, %v548_v4  ;;  %s364_s21 = scalar_lea.sflag [#allocation9], %s952_s28  ;;  %s701_s6 = scalar_lea.vmem %s985_s7, 32 }
  0x46   : > { %p702_p8 = scmp.ne.s32.totalorder %s985_s7, %s701_s6  ;;  %s822_s8 = smov [#allocation8]  }
  0x47   : > { %v307_v10 = vmax.f32 %v306_v7, %v549_v6  ;;  %s705_s10 = sshll.u32 %s822_s8, 4  ;;  %s706_s10 = int_to_ptr.vmem [resolvable:$false] %s705_s10 }
  0x48   : > { %p703_p0 = pnand %p702_p8, %p895_p9  ;;  %s707_s22 = scalar_lea.vmem %s706_s10, 64 }
  0x49   : > { %v355_v9 = vld [vmem:[%s283_s5] sm:$0x3]  ;;  %v308_v12 = vsub.f32 %v298_v2, %v307_v10  ;;  %v315_v13 = vsub.f32 %v547_v3, %v307_v10  ;;  %v323_v14 = vsub.f32 %v548_v4, %v307_v10  ;;  %v331_v15 = vsub.f32 %v549_v6, %v307_v10  ;;  %p708_p5 = scmp.lt.s32.totalorder %s985_s7, %s706_s10  ;;  %p709_p6 = scmp.lt.s32.totalorder %s707_s22, %s701_s6 }
  0x4a   : > { %v356_v11 = vadd.f32 %v550_v8, %v355_v9  ;;  %p704_p2 = pneg %p703_p0 }
  0x4b   : > { %p710_p4 = por %p709_p6, %p708_p5 }
  0x4c   : > { %357 = vst [vmem:[%s283_s5] sm:$0x3] %v356_v11 }
  0x4d   : > { %p711_p7 = pnand %p710_p4, %p704_p2 }
  0x4f   : > { %714 = shalt.err (!%p711_p7)
}
  0x50   : > { %s715_s23 = scalar_lea.hbm %s983_s19, 32  ;;  %s719_s9 = scalar_lea.hbm %s1062_s3, 64 }
  0x51   : > { %p716_p1 = scmp.ne.s32.totalorder %s983_s19, %s715_s23  ;;  %p720_p3 = scmp.lt.s32.totalorder %s983_s19, %s1062_s3 }
  0x52   : > { %p721_p8 = scmp.lt.s32.totalorder %s719_s9, %s715_s23 }
  0x53   : > { %p717_p10 = pnand %p716_p1, %p895_p9 }
  0x54   : > { %p722_p0 = por %p721_p8, %p720_p3 }
  0x55   : > { %p718_p13 = pneg %p717_p10 }
  0x57   : > { %p723_p2 = pnand %p722_p0, %p718_p13 }
  0x59   : > { %726 = shalt.err (!%p723_p2)
}
  0x5a   : > { %563 = dma.vmem_to_hbm [thread:$0]  (%p895_p9), %s985_s7, 32, %s983_s19, %s364_s21   ;;  %v309_v16 = vmul.f32 1.442695, %v308_v12  ;;  %v316_v17 = vmul.f32 1.442695, %v315_v13  ;;  %vm311_vm1 = vcmp.eq.s32.totalorder %v971_v1, 0 }
  0x5b   : > { %v324_v18 = vmul.f32 1.442695, %v323_v14  ;;  %v332_v19 = vmul.f32 1.442695, %v331_v15  ;;  %vm319_vm2 = vcmp.eq.s32.totalorder %v971_v1, 1  ;;  %v312_v28 = vsel %vm311_vm1, %v308_v12, 0.0  ;;  %s376_s19 = scalar_lea.hbm %s1061_s2, %s553_s24 }
  0x5c   : > { %633 = vpow2.f32 %v309_v16  ;;  %v314_v29 = vsel %vm311_vm1, 0.1, %v821_v0  ;;  %vm327_vm3 = vcmp.eq.s32.totalorder %v971_v1, 2  ;;  %v320_v31 = vsel %vm319_vm2, %v315_v13, %v312_v28  ;;  %v352_v49 = vld [vmem:[%s966_s4] sm:$0x3]  ;;  %s378_s7 = sshll.u32 %s966_s4, 4  ;;  %s379_s7 = int_to_ptr.vmem [resolvable:$true] %s378_s7 }
  0x5d   : > { %635 = vpow2.f32 %v316_v17  ;;  %v322_v32 = vsel %vm319_vm2, 0.2, %v314_v29  ;;  %vm335_vm4 = vcmp.eq.s32.totalorder %v971_v1, 3  ;;  %v328_v34 = vsel %vm327_vm3, %v323_v14, %v320_v31  ;;  %s359_s21 = scalar_lea.sflag [#allocation4], %s952_s28  ;;  %s727_s6 = scalar_lea.vmem %s379_s7, 32 }
  0x5e   : > { %637 = vpow2.f32 %v324_v18  ;;  %v330_v35 = vsel %vm327_vm3, 0.3, %v322_v32  ;;  %v336_v38 = vsel %vm335_vm4, %v331_v15, %v328_v34  ;;  %p728_p5 = scmp.ne.s32.totalorder %s379_s7, %s727_s6  ;;  %s823_s8 = smov [#allocation7]  }
  0x5f   : > { %639 = vpow2.f32 %v332_v19  ;;  %v338_v41 = vsel %vm335_vm4, 0.4, %v330_v35  ;;  %s731_s10 = sshll.u32 %s823_s8, 4  ;;  %s732_s10 = int_to_ptr.vmem [resolvable:$false] %s731_s10 }
  0x60   : > { %p729_p6 = pnand %p728_p5, %p895_p9  ;;  %s733_s22 = scalar_lea.vmem %s732_s10, 64 }
  0x61   : > { %p734_p7 = scmp.lt.s32.totalorder %s379_s7, %s732_s10  ;;  %p735_p1 = scmp.lt.s32.totalorder %s733_s22, %s727_s6 }
  0x62   : > { %p730_p4 = pneg %p729_p6 }
  0x63   : > { %p736_p10 = por %p735_p1, %p734_p7 }
  0x65   : > { %p737_p13 = pnand %p736_p10, %p730_p4 }
  0x69   : > { %v634_v20 = vpop.eup %633 }
  0x6a   : > { %v636_v21 = vpop.eup %635  ;;  %v313_v27 = vsel %vm311_vm1, %v634_v20, 0.0 }
  0x6b   : > { %v638_v22 = vpop.eup %637  ;;  %v318_v23 = vadd.f32 %v636_v21, %v634_v20  ;;  %v321_v30 = vsel %vm319_vm2, %v636_v21, %v313_v27 }
  0x6c   : > { %v640_v24 = vpop.eup %639  ;;  %v329_v33 = vsel %vm327_vm3, %v638_v22, %v321_v30 }
  0x6d   : > { %v326_v25 = vadd.f32 %v638_v22, %v318_v23  ;;  %v337_v36 = vsel %vm335_vm4, %v640_v24, %v329_v33 }
  0x6f   : > { %v334_v26 = vadd.f32 %v640_v24, %v326_v25 }
  0x71   : > { %641 = vlog2.f32 %v334_v26 }
  0x72   : > { %643 = vrcp.f32 %v334_v26 }
  0x7e   : > { %v642_v37 = vpop.eup %641 }
  0x7f   : > { %v644_v39 = vpop.eup %643  ;;  %v340_v40 = vmul.f32 0.6931472, %v642_v37 }
  0x80   : > { %v345_v42 = vmul.f32 %v644_v39, %v337_v36 }
  0x81   : > { %v341_v43 = vsub.f32 %v336_v38, %v340_v40 }
  0x82   : > { %v346_v44 = vsub.f32 1.0, %v345_v42 }
  0x83   : > { %v342_v45 = vmul.f32 %v341_v43, %v338_v41 }
  0x84   : > { %v347_v46 = vmul.f32 %v346_v44, %v346_v44 }
  0x85   : > { %v343_v47 = vsub.f32 0.0, %v342_v45 }
  0x87   : > { %v348_v48 = vmul.f32 %v347_v46, %v343_v47 }
  0x89   : > { %v349_v50 = vsel %vm297_vm0, %v348_v48, 0.0 }
  0x8a   : > { %v353_v51 = vadd.f32 %v352_v49, %v349_v50 }
  0x8c   : > { %354 = vst [vmem:[%s966_s4] sm:$0x3] %v353_v51 }
  0x8d   : > { %740 = shalt.err (!%p737_p13)
}
  0x8e   : > { %s741_s15 = scalar_lea.hbm %s376_s19, 32  ;;  %s745_s24 = scalar_lea.hbm %s1061_s2, 64 }
  0x8f   : > { %p742_p3 = scmp.ne.s32.totalorder %s376_s19, %s741_s15  ;;  %p746_p2 = scmp.lt.s32.totalorder %s376_s19, %s1061_s2 }
  0x90   : > { %p747_p5 = scmp.lt.s32.totalorder %s745_s24, %s741_s15 }
  0x91   : > { %p743_p8 = pnand %p742_p3, %p895_p9 }
  0x92   : > { %p748_p6 = por %p747_p5, %p746_p2 }
  0x93   : > { %p744_p0 = pneg %p743_p8 }
  0x95   : > { %p749_p12 = pnand %p748_p6, %p744_p0 }
  0x97   : > { %752 = shalt.err (!%p749_p12)
}
  0x98   : > { %562 = dma.vmem_to_hbm [thread:$0]  (%p895_p9), %s379_s7, 32, %s376_s19, %s359_s21  }
  0x99 PF: > { %s404_s0 = sand.u32 1, %s795_s12   ;;  %p1071_p4 = scmp.ge.s32.totalorder %s815_s17, 2 }
  0x9a   : > { %s405_s9 = scalar_lea.sflag [#allocation4], %s404_s0 }
  0x9b   : > { %p574_p7 = pnand %p1071_p4, %p902_p11 }
  0x9d   : > { %p575_p1 = pneg %p574_p7 }
  0x9f   : > { %786 = dma.done.wait (%p575_p1), %s405_s9, 32  }
  0xa0   : > { %788 = vsyncadd (%p575_p1), %s405_s9, 4294967264  ;;  %s414_s30 = scalar_lea.sflag [#allocation9], %s404_s0 }
  0xa1   : > { %790 = dma.done.wait (%p575_p1), %s414_s30, 32  }
  0xa2   : > { %792 = vsyncadd (%p575_p1), %s414_s30, 4294967264  ;;  %s26_s17 = sadd.s32 1, %s815_s17   ;;  %s1072_s12 = smov %s799_s13 }
  0xa3   : > { %p23_p12 = scmp.ge.s32.totalorder %s26_s17, 4   ;;  %s1073_s13 = smov %s803_s14 }
  0xa4   : > { %s1074_s14 = smov %s900_s26  ;;  %s1075_s15 = smov %s811_s16 }
  0xa5   : > { %s1076_s16 = smov %s1078_s20  ;;  %25 = sbr.rel (!%p23_p12) target bundleno = 12 (0xc), region = 110 }
  0xaa   :  { %419 = vsyncpa [#allocation3], 1 }
  0xab   :  { %421 = vsyncpa [#allocation3 + $0x1], 1 }
  0xac   :  { %422 = vsyncpa [#allocation6], 1 }
  0xad   :  { %424 = vsyncpa [#allocation6 + $0x1], 1 }
  0xae   :  { %425 = vsyncpa [#allocation4], 1 }
  0xaf   :  { %427 = vsyncpa [#allocation4 + $0x1], 1 }
  0xb0   :  { %428 = vsyncpa [#allocation9], 1 }
  0xb1   :  { %430 = vsyncpa [#allocation9 + $0x1], 1 }

</bundles_post_ra>
